<compile_context>
chip_gen: v7x
topology: tpu7x:2x2x1
jax: 0.10.0
libtpu: 0.0.40
codegen_flags: <defaults>
</compile_context>

<pallas_src>
import jax
import jax.numpy as jnp
from jax.experimental import pallas as pl
from jax.experimental.pallas import tpu as pltpu


# --------------------------------------------------------------------------------------
# Kernel: se3_transform   out[b] = R[b] @ P[b] + t[b]
#   r_ref: (BB, 3, 3)  t_ref: (BB, 3, 1)  p_ref / o_ref: (BB, 3, TILE_N)
# The 3x3 @ 3xN matmul is unrolled over K=3 as broadcast multiply-adds: pure VPU code.
# --------------------------------------------------------------------------------------
def _se3_kernel(r_ref, t_ref, p_ref, o_ref):
    bb = p_ref.shape[0]
    for b in range(bb):           # static unroll over the batch sub-block
        r = r_ref[b]              # (3, 3)
        t = t_ref[b]              # (3, 1)
        p = p_ref[b]              # (3, TILE_N)
        o_ref[b] = (r[:, 0:1] * p[0:1, :]
                    + r[:, 1:2] * p[1:2, :]
                    + r[:, 2:3] * p[2:3, :]
                    + t)


def se3_transform(pcd, r, t, *, tile_n=8192, batch_block=8):
    """pcd: (B,3,N), r: (B,3,3), t: (B,3)  ->  (B,3,N)   (all same float dtype)."""
    B, C, N = pcd.shape
    assert C == 3
    t3 = t.reshape(B, 3, 1)

    bb = min(batch_block, B)
    # Lane-dense tile along N: either the full N (always a legal block) or a large
    # multiple of 128 lanes.  Per-step VMEM footprint is ~2 (in+out) * 2 (double
    # buffer) * bb * 3 * tn * 4 bytes, which stays well inside the default scoped VMEM
    # limit on v5e / v6e / v7x even at bb=8, tn=8192 (~3 MiB).
    assert tile_n % 128 == 0
    tn = N if N <= tile_n else tile_n

    grid = (pl.cdiv(B, bb), pl.cdiv(N, tn))
    return pl.pallas_call(
        _se3_kernel,
        out_shape=jax.ShapeDtypeStruct((B, 3, N), pcd.dtype),
        grid=grid,
        in_specs=[
            # R / t index maps ignore the N grid axis -> they stay resident in VMEM
            # across all N tiles of a batch block (no re-DMA per tile).
            pl.BlockSpec((bb, 3, 3), lambda b, n: (b, 0, 0)),
            pl.BlockSpec((bb, 3, 1), lambda b, n: (b, 0, 0)),
            pl.BlockSpec((bb, 3, tn), lambda b, n: (b, 0, n)),
        ],
        out_specs=pl.BlockSpec((bb, 3, tn), lambda b, n: (b, 0, n)),
        compiler_params=pltpu.CompilerParams(
            dimension_semantics=("parallel", "parallel")),
    )(r, t3, pcd)


# --------------------------------------------------------------------------------------
# SE(3) composition: r_pred = r_fine @ r_coarse,  t_pred = r_fine @ t_coarse + t_fine.
# Tiny (B,3,3) work -> XLA handles it in-register; a custom kernel is pure overhead.
# --------------------------------------------------------------------------------------
def compose_se3(r_fine, t_fine, r_coarse, t_coarse):
    r_pred = jnp.einsum("bij,bjk->bik", r_fine, r_coarse)
    t_pred = jnp.einsum("bij,bj->bi", r_fine, t_coarse) + t_fine
    return r_pred, t_pred


# --------------------------------------------------------------------------------------
# CoarseToFineNetwork forward-pass equivalent (args.modules == [])
# --------------------------------------------------------------------------------------
class CoarseToFineNetworkPallas:
    def __init__(self, modules=(), decode=False, training=True):
        self.decode = decode
        self.coarse = "coarse" in modules
        self.fine = "fine" in modules
        self.training = training
        if self.coarse or self.fine:
            # TODO(synk): CoarseRegister / FineRegister have no definitions in the
            # reference module; only the disabled-branch path can be translated.
            raise NotImplementedError(
                "CoarseRegister / FineRegister are not defined in the reference source")
        # TODO(synk): SE3EquivariantNetwork (feature_extractor) has no definition
        # available; its forward pass cannot be translated.

    def __call__(self, src_pcd, tgt_pcd, src_p, tgt_p, r_gt, t_gt):
        B = src_pcd.shape[0]
        dtype = src_pcd.dtype

        # src_gt is only consumed by the fine register; skip the full HBM read+write
        # pass over the point cloud when it is dead (fine branch disabled).
        src_gt = (se3_transform(src_pcd, r_gt, t_gt)
                  if (self.training and self.fine) else None)
        del src_gt

        # feature_extractor(src_pcd) / feature_extractor(tgt_pcd):
        # TODO(synk): SE3EquivariantNetwork has no definition available.

        # Coarse branch disabled -> identity transform.
        r_coarse = jnp.broadcast_to(jnp.eye(3, dtype=dtype), (B, 3, 3))
        t_coarse = jnp.zeros((B, 3), dtype=dtype)
        # se3_transform(src_pcd, I, 0) == src_pcd: short-circuit the identity instead
        # of streaming the whole point cloud through another full read+write pass.
        # (With the coarse branch enabled, se3_transform(src_pcd, r_coarse, t_coarse)
        #  would run the Pallas kernel here.)

        # Fine branch disabled -> identity transform.
        r_fine = jnp.broadcast_to(jnp.eye(3, dtype=dtype), (B, 3, 3))
        t_fine = jnp.zeros((B, 3), dtype=dtype)

        r_pred, t_pred = compose_se3(r_fine, t_fine, r_coarse, t_coarse)
        return r_pred, t_pred


# --------------------------------------------------------------------------------------
if __name__ == "__main__":
    B, N = 2, 1024
    key = jax.random.PRNGKey(0)
    k1, k2, k3 = jax.random.split(key, 3)

    src_pcd = jax.random.normal(k1, (B, 3, N), dtype=jnp.float32)
    tgt_pcd = jax.random.normal(k2, (B, 3, N), dtype=jnp.float32)

    # Deterministic ground-truth rigid transform (rotations about z, random translation).
    theta = jnp.array([0.3, -0.7], dtype=jnp.float32)
    c, s = jnp.cos(theta), jnp.sin(theta)
    z = jnp.zeros_like(theta)
    o = jnp.ones_like(theta)
    r_gt = jnp.stack(
        [jnp.stack([c, -s, z], axis=-1),
         jnp.stack([s, c, z], axis=-1),
         jnp.stack([z, z, o], axis=-1)],
        axis=-2,
    )  # (B, 3, 3)
    t_gt = jax.random.normal(k3, (B, 3), dtype=jnp.float32)

    model = CoarseToFineNetworkPallas(modules=(), decode=False, training=True)
    r_pred, t_pred = model(src_pcd, tgt_pcd, None, None, r_gt, t_gt)

    # Exercise + validate the se3_transform Pallas kernel (the kernel the training /
    # coarse-enabled paths run) against a pure-JAX reference:
    out_default = se3_transform(src_pcd, r_gt, t_gt)                              # single N tile
    out_tiled = se3_transform(src_pcd, r_gt, t_gt, tile_n=256, batch_block=1)     # multi-tile path
    jax.block_until_ready((r_pred, t_pred, out_default, out_tiled))

    ref = jnp.einsum("bij,bjn->bin", r_gt, src_pcd) + t_gt[:, :, None]
    assert jnp.allclose(out_default, ref, atol=1e-5), "se3_transform mismatch (default tiling)"
    assert jnp.allclose(out_tiled, ref, atol=1e-5), "se3_transform mismatch (N-tiled path)"

    # With coarse/fine branches disabled, the composed prediction is the identity.
    assert jnp.allclose(r_pred, jnp.broadcast_to(jnp.eye(3), (B, 3, 3)), atol=1e-6)
    assert jnp.allclose(t_pred, jnp.zeros((B, 3)), atol=1e-6)

    print("KERNEL_OK")
</pallas_src>

<mosaic_0001>
module attributes {stable_mosaic.version = 11 : i64} {
  func.func @_se3_kernel(%arg0: i32, %arg1: i32, %arg2: memref<2x3x3xf32, #tpu.memory_space<vmem>>, %arg3: memref<2x3x1xf32, #tpu.memory_space<vmem>>, %arg4: memref<2x3x1024xf32, #tpu.memory_space<vmem>>, %arg5: memref<2x3x1024xf32, #tpu.memory_space<vmem>>) attributes {dimension_semantics = [#tpu.dimension_semantics<parallel>, #tpu.dimension_semantics<parallel>], iteration_bounds = array<i64: 1, 1>, scalar_prefetch = 0 : i64, scratch_operands = 0 : i64, tpu.core_type = #tpu.core_type<tc>, window_params = [{transform_indices = @transform_0, window_bounds = array<i64: 2, 3, 3>}, {transform_indices = @transform_1, window_bounds = array<i64: 2, 3, 1>}, {transform_indices = @transform_2, window_bounds = array<i64: 2, 3, 1024>}, {transform_indices = @transform_3, window_bounds = array<i64: 2, 3, 1024>}]} {
    %c0 = arith.constant 0 : index
    %c0_0 = arith.constant 0 : index
    %c0_1 = arith.constant 0 : index
    %0 = vector.load %arg2[%c0, %c0_0, %c0_1] : memref<2x3x3xf32, #tpu.memory_space<vmem>>, vector<1x3x3xf32>
    %1 = vector.shape_cast %0 : vector<1x3x3xf32> to vector<3x3xf32>
    %c0_2 = arith.constant 0 : index
    %c0_3 = arith.constant 0 : index
    %c0_4 = arith.constant 0 : index
    %2 = vector.load %arg3[%c0_2, %c0_3, %c0_4] : memref<2x3x1xf32, #tpu.memory_space<vmem>>, vector<1x3x1xf32>
    %3 = vector.shape_cast %2 : vector<1x3x1xf32> to vector<3x1xf32>
    %c0_5 = arith.constant 0 : index
    %c0_6 = arith.constant 0 : index
    %c0_7 = arith.constant 0 : index
    %4 = vector.load %arg4[%c0_5, %c0_6, %c0_7] : memref<2x3x1024xf32, #tpu.memory_space<vmem>>, vector<1x3x1024xf32>
    %5 = vector.shape_cast %4 : vector<1x3x1024xf32> to vector<3x1024xf32>
    %6 = vector.extract_strided_slice %1 {offsets = [0, 0], sizes = [3, 1], strides = [1, 1]} : vector<3x3xf32> to vector<3x1xf32>
    %7 = vector.extract_strided_slice %5 {offsets = [0, 0], sizes = [1, 1024], strides = [1, 1]} : vector<3x1024xf32> to vector<1x1024xf32>
    %8 = vector.broadcast %6 : vector<3x1xf32> to vector<3x1024xf32>
    %9 = vector.broadcast %7 : vector<1x1024xf32> to vector<3x1024xf32>
    %10 = arith.mulf %8, %9 : vector<3x1024xf32>
    %11 = vector.extract_strided_slice %1 {offsets = [0, 1], sizes = [3, 1], strides = [1, 1]} : vector<3x3xf32> to vector<3x1xf32>
    %12 = vector.extract_strided_slice %5 {offsets = [1, 0], sizes = [1, 1024], strides = [1, 1]} : vector<3x1024xf32> to vector<1x1024xf32>
    %13 = vector.broadcast %11 : vector<3x1xf32> to vector<3x1024xf32>
    %14 = vector.broadcast %12 : vector<1x1024xf32> to vector<3x1024xf32>
    %15 = arith.mulf %13, %14 : vector<3x1024xf32>
    %16 = arith.addf %10, %15 : vector<3x1024xf32>
    %17 = vector.extract_strided_slice %1 {offsets = [0, 2], sizes = [3, 1], strides = [1, 1]} : vector<3x3xf32> to vector<3x1xf32>
    %18 = vector.extract_strided_slice %5 {offsets = [2, 0], sizes = [1, 1024], strides = [1, 1]} : vector<3x1024xf32> to vector<1x1024xf32>
    %19 = vector.broadcast %17 : vector<3x1xf32> to vector<3x1024xf32>
    %20 = vector.broadcast %18 : vector<1x1024xf32> to vector<3x1024xf32>
    %21 = arith.mulf %19, %20 : vector<3x1024xf32>
    %22 = arith.addf %16, %21 : vector<3x1024xf32>
    %23 = vector.broadcast %3 : vector<3x1xf32> to vector<3x1024xf32>
    %24 = arith.addf %22, %23 : vector<3x1024xf32>
    %c0_8 = arith.constant 0 : index
    %c0_9 = arith.constant 0 : index
    %c0_10 = arith.constant 0 : index
    %25 = vector.load %arg5[%c0_8, %c0_9, %c0_10] : memref<2x3x1024xf32, #tpu.memory_space<vmem>>, vector<1x3x1024xf32>
    %26 = vector.shape_cast %25 : vector<1x3x1024xf32> to vector<3x1024xf32>
    %27 = vector.shape_cast %24 : vector<3x1024xf32> to vector<1x3x1024xf32>
    tpu.vector_store %arg5[%c0_8, %c0_9, %c0_10], %27 {strides = array<i32>} : memref<2x3x1024xf32, #tpu.memory_space<vmem>>, vector<1x3x1024xf32>,
    %c1 = arith.constant 1 : index
    %c0_11 = arith.constant 0 : index
    %c0_12 = arith.constant 0 : index
    %28 = vector.load %arg2[%c1, %c0_11, %c0_12] : memref<2x3x3xf32, #tpu.memory_space<vmem>>, vector<1x3x3xf32>
    %29 = vector.shape_cast %28 : vector<1x3x3xf32> to vector<3x3xf32>
    %c1_13 = arith.constant 1 : index
    %c0_14 = arith.constant 0 : index
    %c0_15 = arith.constant 0 : index
    %30 = vector.load %arg3[%c1_13, %c0_14, %c0_15] : memref<2x3x1xf32, #tpu.memory_space<vmem>>, vector<1x3x1xf32>
    %31 = vector.shape_cast %30 : vector<1x3x1xf32> to vector<3x1xf32>
    %c1_16 = arith.constant 1 : index
    %c0_17 = arith.constant 0 : index
    %c0_18 = arith.constant 0 : index
    %32 = vector.load %arg4[%c1_16, %c0_17, %c0_18] : memref<2x3x1024xf32, #tpu.memory_space<vmem>>, vector<1x3x1024xf32>
    %33 = vector.shape_cast %32 : vector<1x3x1024xf32> to vector<3x1024xf32>
    %34 = vector.extract_strided_slice %29 {offsets = [0, 0], sizes = [3, 1], strides = [1, 1]} : vector<3x3xf32> to vector<3x1xf32>
    %35 = vector.extract_strided_slice %33 {offsets = [0, 0], sizes = [1, 1024], strides = [1, 1]} : vector<3x1024xf32> to vector<1x1024xf32>
    %36 = vector.broadcast %34 : vector<3x1xf32> to vector<3x1024xf32>
    %37 = vector.broadcast %35 : vector<1x1024xf32> to vector<3x1024xf32>
    %38 = arith.mulf %36, %37 : vector<3x1024xf32>
    %39 = vector.extract_strided_slice %29 {offsets = [0, 1], sizes = [3, 1], strides = [1, 1]} : vector<3x3xf32> to vector<3x1xf32>
    %40 = vector.extract_strided_slice %33 {offsets = [1, 0], sizes = [1, 1024], strides = [1, 1]} : vector<3x1024xf32> to vector<1x1024xf32>
    %41 = vector.broadcast %39 : vector<3x1xf32> to vector<3x1024xf32>
    %42 = vector.broadcast %40 : vector<1x1024xf32> to vector<3x1024xf32>
    %43 = arith.mulf %41, %42 : vector<3x1024xf32>
    %44 = arith.addf %38, %43 : vector<3x1024xf32>
    %45 = vector.extract_strided_slice %29 {offsets = [0, 2], sizes = [3, 1], strides = [1, 1]} : vector<3x3xf32> to vector<3x1xf32>
    %46 = vector.extract_strided_slice %33 {offsets = [2, 0], sizes = [1, 1024], strides = [1, 1]} : vector<3x1024xf32> to vector<1x1024xf32>
    %47 = vector.broadcast %45 : vector<3x1xf32> to vector<3x1024xf32>
    %48 = vector.broadcast %46 : vector<1x1024xf32> to vector<3x1024xf32>
    %49 = arith.mulf %47, %48 : vector<3x1024xf32>
    %50 = arith.addf %44, %49 : vector<3x1024xf32>
    %51 = vector.broadcast %31 : vector<3x1xf32> to vector<3x1024xf32>
    %52 = arith.addf %50, %51 : vector<3x1024xf32>
    %c1_19 = arith.constant 1 : index
    %c0_20 = arith.constant 0 : index
    %c0_21 = arith.constant 0 : index
    %53 = vector.load %arg5[%c1_19, %c0_20, %c0_21] : memref<2x3x1024xf32, #tpu.memory_space<vmem>>, vector<1x3x1024xf32>
    %54 = vector.shape_cast %53 : vector<1x3x1024xf32> to vector<3x1024xf32>
    %55 = vector.shape_cast %52 : vector<3x1024xf32> to vector<1x3x1024xf32>
    tpu.vector_store %arg5[%c1_19, %c0_20, %c0_21], %55 {strides = array<i32>} : memref<2x3x1024xf32, #tpu.memory_space<vmem>>, vector<1x3x1024xf32>,
    return
  }
  func.func @transform_0(%arg0: i32, %arg1: i32) -> (i32, i32, i32) {
    %c0_i32 = arith.constant 0 : i32
    %c0_i32_0 = arith.constant 0 : i32
    %c0_i32_1 = arith.constant 0 : i32
    return %arg0, %c0_i32, %c0_i32_0 : i32, i32, i32
  }
  func.func @transform_1(%arg0: i32, %arg1: i32) -> (i32, i32, i32) {
    %c0_i32 = arith.constant 0 : i32
    %c0_i32_0 = arith.constant 0 : i32
    %c0_i32_1 = arith.constant 0 : i32
    return %arg0, %c0_i32, %c0_i32_0 : i32, i32, i32
  }
  func.func @transform_2(%arg0: i32, %arg1: i32) -> (i32, i32, i32) {
    %c0_i32 = arith.constant 0 : i32
    %c0_i32_0 = arith.constant 0 : i32
    return %arg0, %c0_i32, %arg1 : i32, i32, i32
  }
  func.func @transform_3(%arg0: i32, %arg1: i32) -> (i32, i32, i32) {
    %c0_i32 = arith.constant 0 : i32
    %c0_i32_0 = arith.constant 0 : i32
    return %arg0, %c0_i32, %arg1 : i32, i32, i32
  }
}

</mosaic_0001>

<bundles_post_ra>
// kernel: tpu_custom_call.1
= control target key start
LH: loop header
LB: loop body
LE: loop exit
PB: predicated region body
PF: predicated region fallthrough
CT: control target
= control target key end

     0   :  { %v667_v0 = vmov 0   ;;  %v668_v3 = vmov 1   ;;  %v669_v4 = vmov 2   ;;  %v29_v7 = vlaneseq  ;;  %s1014_s0 = inlined_call_operand.vmem [shape: f32[2,3,3], index: 0, kind: input, shape index: {}]   ;;  %s1015_s1 = inlined_call_operand.vmem [shape: f32[2,3,1], index: 1, kind: input, shape index: {}]   ;;  %s1016_s2 = inlined_call_operand.vmem [shape: f32[2,3,1024], index: 2, kind: input, shape index: {}]   ;;  %s1017_s3 = inlined_call_operand.vmem [shape: f32[2,3,1024], index: 3, kind: output, shape index: {}]  }
   0x1   :  { %661 = vset.pattern.permute.xlu1 %v667_v0  ;;  %659 = vset.pattern.permute.xlu0 %v667_v0  ;;  %v646_v1 = vld [vmem:[%s1014_s0 + $0x4] sm:$0x7]  ;;  %v14_v2 = vld [vmem:[%s1014_s0] sm:$0x7]  ;;  %v710_v12 = vld [vmem:[%s1016_s2 + $0x28] sm:$0x77] }
   0x2   :  { %337 = vperm.xlu1 %661, %v646_v1   ;;  %22 = vperm.xlu0 %659, %v14_v2   ;;  %v15_v5 = vld [vmem:[%s1015_s1] sm:$0x7]  ;;  %v647_v6 = vld [vmem:[%s1015_s1 + $0x4] sm:$0x7]  ;;  %v30_v8 = vshrl.u32 %v29_v7, 7 }
   0x3   :  { %v705_v10 = vld [vmem:[%s1016_s2 + $0x20] sm:$0x77]  ;;  %v715_v13 = vld [vmem:[%s1016_s2 + $0x30] sm:$0x77]  ;;  %v721_v15 = vld [vmem:[%s1016_s2 + $0x38] sm:$0x77] }
   0x4   :  { %v31_v9 = vsub.s32 0, %v30_v8  ;;  %v35_v11 = vsub.s32 4, %v30_v8  ;;  %v723_v16 = vsub.s32 1, %v30_v8  ;;  %v725_v17 = vsub.s32 2, %v30_v8  ;;  %v731_v19 = vld [vmem:[%s1016_s2] sm:$0x77] }
   0x5   :  { %v736_v20 = vld [vmem:[%s1016_s2 + $0x8] sm:$0x77]  ;;  %v744_v24 = vld [vmem:[%s1016_s2 + $0x10] sm:$0x77]  ;;  %v749_v25 = vld [vmem:[%s1016_s2 + $0x18] sm:$0x77] }
   0x6   :  { %662 = vset.pattern.permute.xlu1 %v668_v3  ;;  %660 = vset.pattern.permute.xlu0 %v668_v3  ;;  %v347_v14 = vrot.slane %v705_v10, %v31_v9  ;;  %v351_v18 = vrot.slane %v705_v10, %v35_v11  ;;  %v355_v21 = vrot.slane %v710_v12, %v31_v9  ;;  %v119_v26 = vsub.s32 5, %v30_v8 }
   0x7   :  { %425 = vperm.xlu1 %662, %v646_v1   ;;  %110 = vperm.xlu0 %660, %v14_v2   ;;  %v359_v22 = vrot.slane %v710_v12, %v35_v11  ;;  %v363_v23 = vrot.slane %v715_v13, %v31_v9  ;;  %v367_v27 = vrot.slane %v715_v13, %v35_v11  ;;  %v778_v46 = vsub.s32 6, %v30_v8 }
   0x8   :  { %v371_v28 = vrot.slane %v721_v15, %v31_v9  ;;  %v375_v29 = vrot.slane %v721_v15, %v35_v11  ;;  %v754_v30 = vrot.slane %v347_v14, %v31_v9  ;;  %v32_v31 = vrot.slane %v731_v19, %v31_v9 }
   0x9   :  { %v36_v32 = vrot.slane %v731_v19, %v35_v11  ;;  %v40_v33 = vrot.slane %v736_v20, %v31_v9  ;;  %v44_v34 = vrot.slane %v736_v20, %v35_v11  ;;  %v48_v35 = vrot.slane %v744_v24, %v31_v9 }
   0xa   :  { %v52_v36 = vrot.slane %v744_v24, %v35_v11  ;;  %v56_v37 = vrot.slane %v749_v25, %v31_v9  ;;  %v60_v38 = vrot.slane %v749_v25, %v35_v11  ;;  %v764_v39 = vrot.slane %v351_v18, %v31_v9 }
   0xb   :  { %663 = vset.pattern.permute.xlu1 %v669_v4  ;;  %664 = vset.pattern.permute.xlu0 %v669_v4  ;;  %v766_v40 = vrot.slane %v355_v21, %v31_v9  ;;  %v768_v41 = vrot.slane %v359_v22, %v31_v9  ;;  %v770_v42 = vrot.slane %v363_v23, %v31_v9 }
   0xc   :  { %202 = vperm.xlu1 %663, %v14_v2   ;;  %517 = vperm.xlu0 %664, %v646_v1   ;;  %v772_v43 = vrot.slane %v367_v27, %v31_v9  ;;  %v774_v44 = vrot.slane %v371_v28, %v31_v9  ;;  %v776_v45 = vrot.slane %v375_v29, %v31_v9 }
   0xd   :  { %v780_v47 = vrot.slane %v32_v31, %v31_v9  ;;  %v782_v48 = vrot.slane %v36_v32, %v31_v9  ;;  %v784_v49 = vrot.slane %v40_v33, %v31_v9  ;;  %v786_v50 = vrot.slane %v44_v34, %v31_v9 }
   0xe   :  { %v788_v51 = vrot.slane %v48_v35, %v31_v9  ;;  %v790_v52 = vrot.slane %v52_v36, %v31_v9  ;;  %v792_v53 = vrot.slane %v56_v37, %v31_v9  ;;  %v794_v54 = vrot.slane %v60_v38, %v31_v9 }
   0xf   :  { %v431_v55 = vrot.slane %v705_v10, %v723_v16  ;;  %v435_v56 = vrot.slane %v705_v10, %v119_v26  ;;  %v439_v57 = vrot.slane %v710_v12, %v723_v16  ;;  %v443_v58 = vrot.slane %v710_v12, %v119_v26 }
  0x10   :  { %665 = vset.pattern.permute.xlu1 %v667_v0  ;;  %666 = vset.pattern.permute.xlu0 %v667_v0  ;;  %v447_v59 = vrot.slane %v715_v13, %v723_v16  ;;  %v451_v60 = vrot.slane %v715_v13, %v119_v26  ;;  %v455_v61 = vrot.slane %v721_v15, %v723_v16 }
  0x11   :  { %295 = vperm.xlu1 %665, %v15_v5   ;;  %v459_v62 = vrot.slane %v721_v15, %v119_v26  ;;  %v116_v63 = vrot.slane %v731_v19, %v723_v16  ;;  %v120_v0 = vrot.slane %v731_v19, %v119_v26  ;;  %v124_v1 = vrot.slane %v736_v20, %v723_v16 }
  0x12   :  { %v128_v2 = vrot.slane %v736_v20, %v119_v26  ;;  %v132_v3 = vrot.slane %v744_v24, %v723_v16  ;;  %v136_v4 = vrot.slane %v744_v24, %v119_v26  ;;  %v140_v5 = vrot.slane %v749_v25, %v723_v16 }
  0x13   :  { %v821_v7 = vrot.slane %v431_v55, %v723_v16  ;;  %v824_v8 = vrot.slane %v435_v56, %v723_v16  ;;  %v827_v9 = vrot.slane %v439_v57, %v723_v16  ;;  %v830_v11 = vrot.slane %v443_v58, %v723_v16 }
  0x14   :  { %v833_v14 = vrot.slane %v447_v59, %v723_v16  ;;  %v836_v18 = vrot.slane %v451_v60, %v723_v16  ;;  %v839_v21 = vrot.slane %v455_v61, %v723_v16  ;;  %v842_v22 = vrot.slane %v459_v62, %v723_v16 }
  0x15   :  { %610 = vperm.xlu1 %665, %v647_v6   ;;  %v144_v6 = vrot.slane %v749_v25, %v119_v26  ;;  %v845_v23 = vrot.slane %v116_v63, %v723_v16  ;;  %v848_v26 = vrot.slane %v120_v0, %v723_v16  ;;  %v851_v27 = vrot.slane %v124_v1, %v723_v16 }
  0x16   :  { %v854_v28 = vrot.slane %v128_v2, %v723_v16  ;;  %v857_v29 = vrot.slane %v132_v3, %v723_v16  ;;  %v860_v31 = vrot.slane %v136_v4, %v723_v16  ;;  %v863_v32 = vrot.slane %v140_v5, %v723_v16 }
  0x17   :  { %v866_v33 = vrot.slane %v144_v6, %v723_v16  ;;  %v208_v34 = vrot.slane %v731_v19, %v725_v17  ;;  %v212_v35 = vrot.slane %v731_v19, %v778_v46  ;;  %v216_v36 = vrot.slane %v736_v20, %v725_v17 }
  0x18   :  { %v220_v37 = vrot.slane %v736_v20, %v778_v46  ;;  %v224_v38 = vrot.slane %v744_v24, %v725_v17  ;;  %v228_v55 = vrot.slane %v744_v24, %v778_v46  ;;  %v232_v16 = vrot.slane %v749_v25, %v725_v17 }
  0x19   :  { %v236_v56 = vrot.slane %v749_v25, %v778_v46  ;;  %v523_v19 = vrot.slane %v705_v10, %v725_v17  ;;  %v527_v57 = vrot.slane %v705_v10, %v778_v46  ;;  %v531_v20 = vrot.slane %v710_v12, %v725_v17 }
  0x1a   :  { %v535_v58 = vrot.slane %v710_v12, %v778_v46  ;;  %v539_v24 = vrot.slane %v715_v13, %v725_v17  ;;  %v543_v59 = vrot.slane %v715_v13, %v778_v46  ;;  %v547_v25 = vrot.slane %v721_v15, %v725_v17 }
  0x1b   :  { %v551_v60 = vrot.slane %v721_v15, %v778_v46  ;;  %v248_v10 = vrot.slane %v208_v34, %v725_v17  ;;  %v252_v61 = vrot.slane %v212_v35, %v725_v17  ;;  %v256_v62 = vrot.slane %v216_v36, %v725_v17 }
  0x1c   :  { %v260_v12 = vrot.slane %v220_v37, %v725_v17  ;;  %v264_v63 = vrot.slane %v224_v38, %v725_v17  ;;  %v268_v0 = vrot.slane %v228_v55, %v725_v17  ;;  %v272_v13 = vrot.slane %v232_v16, %v725_v17 }
  0x1d   :  { %v276_v1 = vrot.slane %v236_v56, %v725_v17  ;;  %v563_v15 = vrot.slane %v523_v19, %v725_v17  ;;  %v567_v46 = vrot.slane %v527_v57, %v725_v17  ;;  %v571_v4 = vrot.slane %v531_v20, %v725_v17 }
  0x1e   :  { %v575_v5 = vrot.slane %v535_v58, %v725_v17  ;;  %v579_v6 = vrot.slane %v539_v24, %v725_v17  ;;  %v583_v34 = vrot.slane %v543_v59, %v725_v17  ;;  %v587_v35 = vrot.slane %v547_v25, %v725_v17 }
  0x1f   :  { %v591_v36 = vrot.slane %v551_v60, %v725_v17 }
  0x81   :  { %v338_v2 = vpop.permute.xlu1 %337  ;;  %v23_v3 = vpop.permute.xlu0 %22 }
  0x82   :  { %v917_v37 = vmul.f32 %v754_v30, %v338_v2  ;;  %v920_v38 = vmul.f32 %v764_v39, %v338_v2  ;;  %v923_v55 = vmul.f32 %v766_v40, %v338_v2  ;;  %v926_v16 = vmul.f32 %v768_v41, %v338_v2 }
  0x83   :  { %v929_v56 = vmul.f32 %v770_v42, %v338_v2  ;;  %v932_v19 = vmul.f32 %v772_v43, %v338_v2  ;;  %v935_v17 = vmul.f32 %v774_v44, %v338_v2  ;;  %v938_v30 = vmul.f32 %v776_v45, %v338_v2 }
  0x84   :  { %v101_v39 = vmul.f32 %v780_v47, %v23_v3  ;;  %v102_v40 = vmul.f32 %v782_v48, %v23_v3  ;;  %v103_v57 = vmul.f32 %v784_v49, %v23_v3  ;;  %v104_v41 = vmul.f32 %v786_v50, %v23_v3 }
  0x85   :  { %1018 = vst [vmem:[#allocation2_spill] sm:$0xff] %v935_v17  ;;  %1019 = vst [vmem:[#allocation3_spill] sm:$0xff] %v938_v30  ;;  %v105_v42 = vmul.f32 %v788_v51, %v23_v3  ;;  %v106_v20 = vmul.f32 %v790_v52, %v23_v3  ;;  %v107_v43 = vmul.f32 %v792_v53, %v23_v3 }
  0x86   :  { %v108_v44 = vmul.f32 %v794_v54, %v23_v3  ;;  %v426_v58 = vpop.permute.xlu1 %425  ;;  %v111_v24 = vpop.permute.xlu0 %110 }
  0x87   :  { %v500_v45 = vmul.f32 %v821_v7, %v426_v58  ;;  %v501_v47 = vmul.f32 %v824_v8, %v426_v58  ;;  %v951_v48 = vmul.f32 %v827_v9, %v426_v58  ;;  %v954_v49 = vmul.f32 %v830_v11, %v426_v58 }
  0x88   :  { %v957_v50 = vmul.f32 %v833_v14, %v426_v58  ;;  %v960_v51 = vmul.f32 %v836_v18, %v426_v58  ;;  %v963_v52 = vmul.f32 %v839_v21, %v426_v58  ;;  %v966_v53 = vmul.f32 %v842_v22, %v426_v58 }
  0x89   :  { %v185_v54 = vmul.f32 %v845_v23, %v111_v24  ;;  %v186_v7 = vmul.f32 %v848_v26, %v111_v24  ;;  %v187_v8 = vmul.f32 %v851_v27, %v111_v24  ;;  %v188_v9 = vmul.f32 %v854_v28, %v111_v24 }
  0x8a   :  { %1020 = vst [vmem:[#allocation4_spill] sm:$0xff] %v960_v51  ;;  %1021 = vst [vmem:[#allocation5_spill] sm:$0xff] %v963_v52  ;;  %v189_v11 = vmul.f32 %v857_v29, %v111_v24  ;;  %v190_v14 = vmul.f32 %v860_v31, %v111_v24  ;;  %v191_v18 = vmul.f32 %v863_v32, %v111_v24 }
  0x8b   :  { %1022 = vst [vmem:[#allocation6_spill] sm:$0xff] %v966_v53  ;;  %v192_v21 = vmul.f32 %v866_v33, %v111_v24  ;;  %v193_v59 = vadd.f32 %v185_v54, %v101_v39  ;;  %v194_v25 = vadd.f32 %v186_v7, %v102_v40  ;;  %v195_v22 = vadd.f32 %v187_v8, %v103_v57  ;;  %v203_v2 = vpop.permute.xlu1 %202  ;;  %v518_v27 = vpop.permute.xlu0 %517 }
  0x8c   :  { %v196_v60 = vadd.f32 %v188_v9, %v104_v41  ;;  %v197_v23 = vadd.f32 %v189_v11, %v105_v42  ;;  %v198_v3 = vadd.f32 %v190_v14, %v106_v20  ;;  %v199_v26 = vadd.f32 %v191_v18, %v107_v43 }
  0x8d   :  { %v200_v58 = vadd.f32 %v192_v21, %v108_v44  ;;  %v277_v53 = vmul.f32 %v248_v10, %v203_v2  ;;  %v278_v28 = vmul.f32 %v252_v61, %v203_v2  ;;  %v279_v30 = vmul.f32 %v256_v62, %v203_v2 }
  0x8e   :  { %v280_v29 = vmul.f32 %v260_v12, %v203_v2  ;;  %v281_v52 = vmul.f32 %v264_v63, %v203_v2  ;;  %v282_v31 = vmul.f32 %v268_v0, %v203_v2  ;;  %v283_v17 = vmul.f32 %v272_v13, %v203_v2 }
  0x8f   :  { %v284_v32 = vmul.f32 %v276_v1, %v203_v2  ;;  %v592_v51 = vmul.f32 %v563_v15, %v518_v27  ;;  %v593_v33 = vmul.f32 %v567_v46, %v518_v27  ;;  %v594_v39 = vmul.f32 %v571_v4, %v518_v27 }
  0x90   :  { %v595_v40 = vmul.f32 %v575_v5, %v518_v27  ;;  %v596_v57 = vmul.f32 %v579_v6, %v518_v27  ;;  %v597_v41 = vmul.f32 %v583_v34, %v518_v27  ;;  %v598_v24 = vmul.f32 %v587_v35, %v518_v27  ;;  %v296_v20 = vpop.permute.xlu1 %295 }
  0x91   :  { %v599_v42 = vmul.f32 %v591_v36, %v518_v27  ;;  %v285_v43 = vadd.f32 %v277_v53, %v193_v59  ;;  %v286_v44 = vadd.f32 %v278_v28, %v194_v25  ;;  %v287_v54 = vadd.f32 %v279_v30, %v195_v22  ;;  %v1025_v8 = vld [vmem:[#allocation5_spill] sm:$0xff] }
  0x92   :  { %v288_v10 = vadd.f32 %v280_v29, %v196_v60  ;;  %v289_v61 = vadd.f32 %v281_v52, %v197_v23  ;;  %v290_v62 = vadd.f32 %v282_v31, %v198_v3  ;;  %v291_v12 = vadd.f32 %v283_v17, %v199_v26  ;;  %v1027_v9 = vld [vmem:[#allocation6_spill] sm:$0xff] }
  0x93   :  { %v292_v63 = vadd.f32 %v284_v32, %v200_v58  ;;  %v298_v0 = vadd.f32 %v296_v20, %v285_v43  ;;  %v299_v13 = vadd.f32 %v296_v20, %v286_v44  ;;  %v300_v1 = vadd.f32 %v296_v20, %v287_v54 }
  0x94   :  { %v301_v15 = vadd.f32 %v296_v20, %v288_v10  ;;  %v302_v46 = vadd.f32 %v296_v20, %v289_v61  ;;  %v303_v4 = vadd.f32 %v296_v20, %v290_v62  ;;  %v304_v5 = vadd.f32 %v296_v20, %v291_v12 }
  0x95   :  { %v305_v6 = vadd.f32 %v296_v20, %v292_v63  ;;  %v314_v34 = vcombine.low %v298_v0, %v299_v13  ;;  %v508_v36 = vadd.f32 %v500_v45, %v917_v37  ;;  %v509_v53 = vadd.f32 %v501_v47, %v920_v38  ;;  %v1023_v38 = vld [vmem:[#allocation4_spill] sm:$0xff]  ;;  %v1024_v47 = vld [vmem:[#allocation2_spill] sm:$0xff] }
  0x96   :  { %v315_v35 = vcombine.low %v300_v1, %v301_v15  ;;  %v316_v30 = vcombine.low %v302_v46, %v303_v4  ;;  %v510_v17 = vadd.f32 %v951_v48, %v923_v55  ;;  %v511_v52 = vadd.f32 %v954_v49, %v926_v16  ;;  %v1026_v48 = vld [vmem:[#allocation3_spill] sm:$0xff]  ;;  %v611_v49 = vpop.permute.xlu1 %610 }
  0x97   :  { %v317_v7 = vcombine.low %v304_v5, %v305_v6  ;;  %322 = vst [vmem:[%s1017_s3] sm:$0x77] %v314_v34  ;;  %v512_v37 = vadd.f32 %v957_v50, %v929_v56  ;;  %v513_v45 = vadd.f32 %v1023_v38, %v932_v19  ;;  %v514_v55 = vadd.f32 %v1025_v8, %v1024_v47 }
  0x98   :  { %323 = vst [vmem:[%s1017_s3 + $0x8] sm:$0x77] %v315_v35  ;;  %v515_v16 = vadd.f32 %v1027_v9, %v1026_v48  ;;  %324 = vst [vmem:[%s1017_s3 + $0x10] sm:$0x77] %v316_v30  ;;  %v600_v11 = vadd.f32 %v592_v51, %v508_v36  ;;  %v601_v56 = vadd.f32 %v593_v33, %v509_v53 }
  0x99   :  { %325 = vst [vmem:[%s1017_s3 + $0x18] sm:$0x77] %v317_v7  ;;  %v602_v50 = vadd.f32 %v594_v39, %v510_v17  ;;  %v603_v14 = vadd.f32 %v595_v40, %v511_v52  ;;  %v604_v19 = vadd.f32 %v596_v57, %v512_v37  ;;  %v605_v18 = vadd.f32 %v597_v41, %v513_v45 }
  0x9a   :  { %v606_v21 = vadd.f32 %v598_v24, %v514_v55  ;;  %v607_v59 = vadd.f32 %v599_v42, %v515_v16  ;;  %v613_v25 = vadd.f32 %v611_v49, %v600_v11  ;;  %v614_v22 = vadd.f32 %v611_v49, %v601_v56 }
  0x9b   :  { %v615_v60 = vadd.f32 %v611_v49, %v602_v50  ;;  %v616_v2 = vadd.f32 %v611_v49, %v603_v14  ;;  %v617_v23 = vadd.f32 %v611_v49, %v604_v19  ;;  %v618_v3 = vadd.f32 %v611_v49, %v605_v18 }
  0x9c   :  { %v619_v26 = vadd.f32 %v611_v49, %v606_v21  ;;  %v620_v58 = vadd.f32 %v611_v49, %v607_v59  ;;  %v629_v27 = vcombine.low %v613_v25, %v614_v22 }
  0x9d   :  { %v630_v28 = vcombine.low %v615_v60, %v616_v2  ;;  %v631_v29 = vcombine.low %v617_v23, %v618_v3 }
  0x9e   :  { %v632_v31 = vcombine.low %v619_v26, %v620_v58  ;;  %652 = vst [vmem:[%s1017_s3 + $0x20] sm:$0x77] %v629_v27 }
  0x9f   :  { %653 = vst [vmem:[%s1017_s3 + $0x28] sm:$0x77] %v630_v28  ;;  %654 = vst [vmem:[%s1017_s3 + $0x30] sm:$0x77] %v631_v29 }
  0xa0   :  { %655 = vst [vmem:[%s1017_s3 + $0x38] sm:$0x77] %v632_v31 }

</bundles_post_ra>
